<compile_context>
chip_gen: v5e
topology: v5e:2x2
jax: 0.10.0
libtpu: 0.0.40
codegen_flags: <defaults>
</compile_context>

<pallas_src>
import functools

import jax
import jax.numpy as jnp
from jax.experimental import pallas as pl
from jax.experimental.pallas import tpu as pltpu


# -----------------------------------------------------------------------------
# Path 1 (default for the stub forward): single whole-array HBM-level DMA.
# No VMEM round trip, no grid steps -- minimal work for an identity.
# -----------------------------------------------------------------------------
def _identity_hbm_copy_kernel(x_hbm_ref, o_hbm_ref):
    def body(sem):
        cp = pltpu.make_async_copy(x_hbm_ref, o_hbm_ref, sem)
        cp.start()
        cp.wait()

    pl.run_scoped(body, pltpu.SemaphoreType.DMA)


def _identity_hbm_copy(x: jax.Array) -> jax.Array:
    nbytes = x.size * x.dtype.itemsize
    return pl.pallas_call(
        _identity_hbm_copy_kernel,
        out_shape=jax.ShapeDtypeStruct(x.shape, x.dtype),
        in_specs=[pl.BlockSpec(memory_space=pl.ANY)],
        out_specs=pl.BlockSpec(memory_space=pl.ANY),
        cost_estimate=pl.CostEstimate(
            flops=0, transcendentals=0, bytes_accessed=2 * nbytes
        ),
    )(x)


# -----------------------------------------------------------------------------
# Path 2: tiled, pipelined, lane-dense copy.  This is the scaffolding the real
# img->pcd network should inherit (BlockSpec pipelining, parallel grid axis,
# generation-aware VMEM budgets).
# -----------------------------------------------------------------------------
_LANES = 1024  # lane-dense last dim: large multiple of 128, independent of H*W


def _tiled_identity_kernel(x_ref, o_ref):
    # TODO(synk): the reference forward() is `pass` (returns None); replace
    #             this identity body with the real img->pcd network once it
    #             is defined -- and re-tile around the MXU (128x128 tiles on
    #             v5e, 256-multiples on v6e/v7x, reduction axis last in the
    #             grid, f32 VMEM accumulator, bf16 inputs with
    #             preferred_element_type=jnp.float32; re-budget for v7x's
    #             64 MiB VMEM) instead of inheriting this memcpy layout.
    o_ref[...] = x_ref[...]


def _tpu_vmem_capacity_bytes() -> int:
    try:
        return int(pltpu.get_tpu_info().vmem_capacity_bytes)
    except Exception:
        return 64 * 1024 * 1024  # conservative: assume v7x-class VMEM


def _tiled_identity(x: jax.Array) -> jax.Array:
    orig_shape = x.shape
    n = x.size
    itemsize = x.dtype.itemsize

    # --- generation-aware budgets --------------------------------------------
    vmem_cap = _tpu_vmem_capacity_bytes()
    if vmem_cap >= 128 * 1024 * 1024:           # v5e / v6e (128 MiB physical)
        target_block_bytes = 12 * 1024 * 1024
        vmem_limit_bytes = 64 * 1024 * 1024
    else:                                       # v7x-class (64 MiB physical)
        target_block_bytes = 8 * 1024 * 1024
        vmem_limit_bytes = 48 * 1024 * 1024

    # --- lane-dense 2-D factoring (glue: plain JAX reshape / pad) ------------
    lanes = _LANES
    x1d = x.reshape(-1)
    pad = (-n) % lanes
    if pad:
        x1d = jnp.pad(x1d, (0, pad))
    rows = x1d.size // lanes
    x2d = x1d.reshape(rows, lanes)

    # --- row tiling -----------------------------------------------------------
    row_align = 8 * max(1, 4 // itemsize)       # f32: 8, bf16: 16, int8/fp8: 32
    row_bytes = lanes * itemsize
    total_bytes = rows * row_bytes
    # Cap the block so (a) it stays near the target size and (b) the grid has
    # >= 4 steps when the array allows it, letting v7x's two TensorCores split
    # the "parallel" row axis.
    block_bytes = min(
        target_block_bytes, max(total_bytes // 4, row_align * row_bytes)
    )
    rows_per_block = max(
        row_align, (block_bytes // row_bytes) // row_align * row_align
    )
    row_tile = min(rows_per_block, rows)        # full extent if it all fits
    grid = (pl.cdiv(rows, row_tile),)

    out2d = pl.pallas_call(
        _tiled_identity_kernel,
        out_shape=jax.ShapeDtypeStruct((rows, lanes), x2d.dtype),
        grid=grid,
        in_specs=[pl.BlockSpec((row_tile, lanes), lambda i: (i, 0))],
        out_specs=pl.BlockSpec((row_tile, lanes), lambda i: (i, 0)),
        compiler_params=pltpu.CompilerParams(
            dimension_semantics=("parallel",),
            vmem_limit_bytes=vmem_limit_bytes,
        ),
        cost_estimate=pl.CostEstimate(
            flops=0,
            transcendentals=0,
            bytes_accessed=2 * rows * lanes * itemsize,
        ),
    )(x2d)

    out1d = out2d.reshape(-1)
    if pad:
        out1d = out1d[:n]
    return out1d.reshape(orig_shape)


# -----------------------------------------------------------------------------
# Public forward.
# -----------------------------------------------------------------------------
def img2pcd_forward(x_nchw: jax.Array, *, use_tiled_pipeline: bool = False):
    """Pallas implementation of Img2PcdModel.forward (reference body is `pass`
    -> identity pass-through of the image tensor).

    Default path is a single HBM-level DMA (cheapest correct identity).
    `use_tiled_pipeline=True` exercises the tiled/pipelined layout the real
    img->pcd network should build on.
    """
    if use_tiled_pipeline:
        return _tiled_identity(x_nchw)
    return _identity_hbm_copy(x_nchw)


img2pcd_forward_jit = jax.jit(
    functools.partial(img2pcd_forward, use_tiled_pipeline=False)
)
img2pcd_forward_tiled_jit = jax.jit(
    functools.partial(img2pcd_forward, use_tiled_pipeline=True)
)


if __name__ == "__main__":
    key = jax.random.PRNGKey(0)
    B, C, H, W = 2, 4, 16, 16
    x = jax.random.normal(key, (B, C, H, W), dtype=jnp.float32)

    # Default stub path: whole-array HBM DMA identity.
    y_dma = jax.block_until_ready(img2pcd_forward_jit(x))
    # Compute-ready tiled path: lane-dense pipelined identity.
    y_tiled = jax.block_until_ready(img2pcd_forward_tiled_jit(x))

    assert y_dma.shape == x.shape and y_dma.dtype == x.dtype
    assert y_tiled.shape == x.shape and y_tiled.dtype == x.dtype
    assert bool(jnp.array_equal(y_dma, x))
    assert bool(jnp.array_equal(y_tiled, x))

    print("KERNEL_OK")
</pallas_src>

<mosaic_0001>
module attributes {stable_mosaic.version = 11 : i64} {
  func.func @_identity_hbm_copy_kernel(%arg0: memref<2x4x16x16xf32, #tpu.memory_space<any>>, %arg1: memref<2x4x16x16xf32, #tpu.memory_space<any>>) attributes {dimension_semantics = [], scalar_prefetch = 0 : i64, scratch_operands = 0 : i64, tpu.core_type = #tpu.core_type<tc>} {
    "tpu.region"() ({
      %0 = tpu.sem_alloc : memref<!tpu.dma_semaphore, #tpu.memory_space<semaphore_mem>>
      tpu.enqueue_dma source(%arg0 : memref<2x4x16x16xf32, #tpu.memory_space<any>>) target(%arg1 : memref<2x4x16x16xf32, #tpu.memory_space<any>>) target_semaphore(%0 : memref<!tpu.dma_semaphore, #tpu.memory_space<semaphore_mem>>)
      tpu.wait_dma2 semaphore(%0 : memref<!tpu.dma_semaphore, #tpu.memory_space<semaphore_mem>>) src(%arg0 : memref<2x4x16x16xf32, #tpu.memory_space<any>>) dst(%arg1 : memref<2x4x16x16xf32, #tpu.memory_space<any>>)
      tpu.yield
    }) : () -> ()
    return
  }
}

</mosaic_0001>

<bundles_post_ra>
// kernel: img2pcd_forward.1
= control target key start
LH: loop header
LB: loop body
LE: loop exit
PB: predicated region body
PF: predicated region fallthrough
CT: control target
= control target key end

     0   :  { %s27_s12 = smov [#allocation2]   ;;  %s28_s13 = smov [#allocation3]   ;;  %s46_s0 = inlined_call_operand.hbm [shape: f32[2,4,16,16], index: 0, kind: input, shape index: {}]   ;;  %s47_s1 = inlined_call_operand.hbm [shape: f32[2,4,16,16], index: 1, kind: output, shape index: {}]  }
   0x1   :  { %s10_s8 = sshll.u32 %s46_s0, 4  ;;  %s12_s11 = sshll.u32 %s47_s1, 4  ;;  %s11_s8 = int_to_ptr.hbm [resolvable:$true] %s10_s8  ;;  %s13_s11 = int_to_ptr.hbm [resolvable:$true] %s12_s11 }
   0x2   :  { %s29_s14 = smov 0  }
   0x3   :  { %16 = dma.general %s11_s8, 2048, %s13_s11, %s27_s12, %s28_s13, [#allocation4], %s29_s14, 0  }
   0x4   :  { %25 = dma.done.wait [#allocation2], 2048 }
   0x5   :  { %26 = vsyncadd [#allocation2], 4294965248 }

</bundles_post_ra>
